<compile_context>
chip_gen: v6e
topology: v6e:2x2x1
jax: 0.10.0
libtpu: 0.0.40
codegen_flags: <defaults>
</compile_context>

<pallas_src>
import jax
import jax.numpy as jnp
from jax.experimental import pallas as pl
from jax.experimental.pallas import tpu as pltpu


# ---------------------------------------------------------------------------
# Kernel: one (batch, time-tile) block.  All blocks are lane-dense in time.
# ---------------------------------------------------------------------------
def _fftnet_kernel(xl_ref, xr_ref, wl_ref, wr_ref, bz_ref, wout_ref, bout_ref,
                   o_ref):
    xl = xl_ref[0]                                    # (C_total, tT)
    xr = xr_ref[0]                                    # (C_total, tT)

    # z = relu(W_l @ x_left + W_r @ x_right + b_fused)     -> (C_out, tT)
    z = (jnp.dot(wl_ref[...], xl, preferred_element_type=jnp.float32)
         + jnp.dot(wr_ref[...], xr, preferred_element_type=jnp.float32)
         + bz_ref[...])                               # (C_out,1) broadcasts on lanes
    z = jnp.maximum(z, 0.0)

    # out = relu(W_out @ z + b_out)                          -> (C_out, tT)
    out = jnp.dot(wout_ref[...], z, preferred_element_type=jnp.float32) + bout_ref[...]
    o_ref[0] = jnp.maximum(out, 0.0).astype(o_ref.dtype)


# ---------------------------------------------------------------------------
# Wrapper (plain-JAX glue: branch fusion, shift slicing, tiling, padding)
# ---------------------------------------------------------------------------
def fftnet_block_forward(params, x_ncl, h_ncl=None, *, shift, max_t_tile=1024):
    """Pallas FFTNetBlock.forward.

    x_ncl : (B, C_in, T)                 (PyTorch NCL layout)
    h_ncl : (B, C_lc, T_h >= T) or None
    returns (B, C_out, T - shift)        (PyTorch NCL layout)
    """
    B, _, T = x_ncl.shape
    assert 0 < shift < T, "shift must satisfy 0 < shift < T"
    t_out = T - shift
    c_out = params["w_out"].shape[0]
    dtype = x_ncl.dtype

    # ---- fuse the x and h branches (one matmul per side) -------------------
    if h_ncl is None:
        xh = x_ncl
        w_l = params["w_xl"]
        w_r = params["w_xr"]
        b_z = params["b_xl"] + params["b_xr"]
    else:
        assert h_ncl.shape[-1] >= T, "conditioning input must be at least as long as x"
        h = h_ncl[:, :, -T:].astype(dtype)            # h[:, :, -x.size(-1):]
        xh = jnp.concatenate([x_ncl, h], axis=1)      # (B, C_in + C_lc, T)
        w_l = jnp.concatenate([params["w_xl"], params["w_hl"]], axis=1)
        w_r = jnp.concatenate([params["w_xr"], params["w_hr"]], axis=1)
        b_z = (params["b_xl"] + params["b_xr"]
               + params["b_hl"] + params["b_hr"])

    c_total = xh.shape[1]
    w_out = params["w_out"]
    b_z = b_z.reshape(c_out, 1).astype(jnp.float32)
    b_out = params["b_out"].reshape(c_out, 1).astype(jnp.float32)

    # Pre-shifted, rectangular slices so in-kernel loads are aligned blocks.
    xh_l = xh[:, :, :t_out]                           # x[:, :, :-shift]
    xh_r = xh[:, :, shift:]                           # x[:, :, shift:]

    # ---- time tiling --------------------------------------------------------
    if t_out <= max_t_tile:
        t_tile = t_out                                # single block == full dim
        t_pad = t_out
    else:
        t_tile = max(128, (max_t_tile // 128) * 128)  # lane-aligned tile
        t_pad = pl.cdiv(t_out, t_tile) * t_tile
    if t_pad != t_out:
        pad = ((0, 0), (0, 0), (0, t_pad - t_out))
        xh_l = jnp.pad(xh_l, pad)
        xh_r = jnp.pad(xh_r, pad)

    grid = (B, t_pad // t_tile)

    x_spec = pl.BlockSpec((1, c_total, t_tile), lambda b, t: (b, 0, t))
    out_spec = pl.BlockSpec((1, c_out, t_tile), lambda b, t: (b, 0, t))

    def w_spec(arr):                                  # full (small) weight block
        return pl.BlockSpec(arr.shape, lambda b, t: (0, 0))

    # Advisory cost estimate: this kernel is HBM-bandwidth bound.
    itemsize = jnp.dtype(dtype).itemsize
    flops = 2 * B * t_out * c_out * (2 * c_total + c_out)
    bytes_accessed = int((xh_l.size + xh_r.size) * itemsize
                         + B * c_out * t_pad * itemsize
                         + (w_l.size + w_r.size + w_out.size
                            + b_z.size + b_out.size) * 4)
    cost = pl.CostEstimate(flops=flops, transcendentals=0,
                           bytes_accessed=bytes_accessed)

    out = pl.pallas_call(
        _fftnet_kernel,
        out_shape=jax.ShapeDtypeStruct((B, c_out, t_pad), dtype),
        grid=grid,
        in_specs=[x_spec, x_spec,
                  w_spec(w_l), w_spec(w_r), w_spec(b_z),
                  w_spec(w_out), w_spec(b_out)],
        out_specs=out_spec,
        compiler_params=pltpu.CompilerParams(
            dimension_semantics=("parallel", "parallel"),
            vmem_limit_bytes=32 * 1024 * 1024),
        cost_estimate=cost,
    )(xh_l, xh_r, w_l, w_r, b_z, w_out, b_out)

    return out[:, :, :t_out]                          # drop time padding


# ---------------------------------------------------------------------------
# Parameter construction (weight-norm reparameterization, NCL matmul layout)
# ---------------------------------------------------------------------------
def _weight_norm_1x1(key, c_in, c_out):
    """Mimic weight_norm(nn.Conv1d(c_in, c_out, 1)): w = g * v / ||v|| (dim=0).

    Returns (W, b) with W in (c_out, c_in) layout (W @ X orientation)."""
    kv, kg, kb = jax.random.split(key, 3)
    v = jax.random.normal(kv, (c_out, c_in, 1), jnp.float32) * 0.5
    g = jax.random.normal(kg, (c_out, 1, 1), jnp.float32) * 0.2 + 1.0
    norm = jnp.sqrt(jnp.sum(v * v, axis=(1, 2), keepdims=True))
    w = (g * v / norm)[:, :, 0]                       # (c_out, c_in)
    b = jax.random.normal(kb, (c_out,), jnp.float32) * 0.1
    return w, b


def make_params(key, in_channels, out_channels, local_condition_channels=None):
    keys = jax.random.split(key, 5)
    params = {}
    params["w_xl"], params["b_xl"] = _weight_norm_1x1(keys[0], in_channels, out_channels)
    params["w_xr"], params["b_xr"] = _weight_norm_1x1(keys[1], in_channels, out_channels)
    if local_condition_channels is not None:
        params["w_hl"], params["b_hl"] = _weight_norm_1x1(
            keys[2], local_condition_channels, out_channels)
        params["w_hr"], params["b_hr"] = _weight_norm_1x1(
            keys[3], local_condition_channels, out_channels)
    params["w_out"], params["b_out"] = _weight_norm_1x1(keys[4], out_channels, out_channels)
    return params


# ---------------------------------------------------------------------------
# Pure-JAX reference (for correctness check)
# ---------------------------------------------------------------------------
def _conv1x1_ref(x_ncl, w, b):
    # x: (B, C_in, L); w: (C_out, C_in); b: (C_out,)
    return jnp.einsum("oc,bcl->bol", w, x_ncl) + b[None, :, None]


def fftnet_block_ref(params, x, h, shift):
    x_l = _conv1x1_ref(x[:, :, :-shift], params["w_xl"], params["b_xl"])
    x_r = _conv1x1_ref(x[:, :, shift:], params["w_xr"], params["b_xr"])
    if h is None:
        z = jax.nn.relu(x_l + x_r)
    else:
        h = h[:, :, -x.shape[-1]:]
        h_l = _conv1x1_ref(h[:, :, :-shift], params["w_hl"], params["b_hl"])
        h_r = _conv1x1_ref(h[:, :, shift:], params["w_hr"], params["b_hr"])
        z = jax.nn.relu(x_l + x_r + h_l + h_r)
    return jax.nn.relu(_conv1x1_ref(z, params["w_out"], params["b_out"]))


# ---------------------------------------------------------------------------
if __name__ == "__main__":
    B, C_IN, C_OUT, T, SHIFT, C_LC = 2, 4, 8, 16, 2, 3

    key = jax.random.PRNGKey(0)
    k_p, k_x, k_h = jax.random.split(key, 3)

    params = make_params(k_p, C_IN, C_OUT, local_condition_channels=C_LC)
    x = jax.random.normal(k_x, (B, C_IN, T), jnp.float32)
    h = jax.random.normal(k_h, (B, C_LC, T + 4), jnp.float32)   # longer than T on purpose

    # Conditioned path (h is not None)
    out_cond = jax.block_until_ready(fftnet_block_forward(params, x, h, shift=SHIFT))
    ref_cond = fftnet_block_ref(params, x, h, SHIFT)
    assert out_cond.shape == (B, C_OUT, T - SHIFT)
    assert jnp.allclose(out_cond, ref_cond, atol=1e-5, rtol=1e-5)

    # Unconditioned path (h is None)
    out_nc = jax.block_until_ready(fftnet_block_forward(params, x, None, shift=SHIFT))
    ref_nc = fftnet_block_ref(params, x, None, SHIFT)
    assert jnp.allclose(out_nc, ref_nc, atol=1e-5, rtol=1e-5)

    # Multi-tile / padded time path (exercises the (B, T/tile) grid + padding)
    T2, SHIFT2 = 300, 5
    x2 = jax.random.normal(jax.random.PRNGKey(1), (B, C_IN, T2), jnp.float32)
    h2 = jax.random.normal(jax.random.PRNGKey(2), (B, C_LC, T2), jnp.float32)
    out2 = jax.block_until_ready(
        fftnet_block_forward(params, x2, h2, shift=SHIFT2, max_t_tile=128))
    ref2 = fftnet_block_ref(params, x2, h2, SHIFT2)
    assert out2.shape == (B, C_OUT, T2 - SHIFT2)
    assert jnp.allclose(out2, ref2, atol=1e-5, rtol=1e-5)

    print("KERNEL_OK")
</pallas_src>

<mosaic_0001>
module attributes {stable_mosaic.version = 11 : i64} {
  func.func @_fftnet_kernel(%arg0: i32, %arg1: i32, %arg2: memref<1x7x14xf32, #tpu.memory_space<vmem>>, %arg3: memref<1x7x14xf32, #tpu.memory_space<vmem>>, %arg4: memref<8x7xf32, #tpu.memory_space<vmem>>, %arg5: memref<8x7xf32, #tpu.memory_space<vmem>>, %arg6: memref<8x1xf32, #tpu.memory_space<vmem>>, %arg7: memref<8x8xf32, #tpu.memory_space<vmem>>, %arg8: memref<8x1xf32, #tpu.memory_space<vmem>>, %arg9: memref<1x8x14xf32, #tpu.memory_space<vmem>>) attributes {dimension_semantics = [#tpu.dimension_semantics<parallel>, #tpu.dimension_semantics<parallel>], iteration_bounds = array<i64: 2, 1>, scalar_prefetch = 0 : i64, scratch_operands = 0 : i64, tpu.core_type = #tpu.core_type<tc>, window_params = [{transform_indices = @transform_0, window_bounds = array<i64: 1, 7, 14>}, {transform_indices = @transform_1, window_bounds = array<i64: 1, 7, 14>}, {pipeline_mode = #tpu.pipeline_mode<synchronous>, transform_indices = @transform_2, window_bounds = array<i64: 8, 7>}, {pipeline_mode = #tpu.pipeline_mode<synchronous>, transform_indices = @transform_3, window_bounds = array<i64: 8, 7>}, {pipeline_mode = #tpu.pipeline_mode<synchronous>, transform_indices = @transform_4, window_bounds = array<i64: 8, 1>}, {pipeline_mode = #tpu.pipeline_mode<synchronous>, transform_indices = @transform_5, window_bounds = array<i64: 8, 8>}, {pipeline_mode = #tpu.pipeline_mode<synchronous>, transform_indices = @transform_6, window_bounds = array<i64: 8, 1>}, {transform_indices = @transform_7, window_bounds = array<i64: 1, 8, 14>}]} {
    %c0 = arith.constant 0 : index
    %c0_0 = arith.constant 0 : index
    %c0_1 = arith.constant 0 : index
    %0 = vector.load %arg2[%c0, %c0_0, %c0_1] : memref<1x7x14xf32, #tpu.memory_space<vmem>>, vector<1x7x14xf32>
    %1 = vector.shape_cast %0 : vector<1x7x14xf32> to vector<7x14xf32>
    %c0_2 = arith.constant 0 : index
    %c0_3 = arith.constant 0 : index
    %c0_4 = arith.constant 0 : index
    %2 = vector.load %arg3[%c0_2, %c0_3, %c0_4] : memref<1x7x14xf32, #tpu.memory_space<vmem>>, vector<1x7x14xf32>
    %3 = vector.shape_cast %2 : vector<1x7x14xf32> to vector<7x14xf32>
    %c0_5 = arith.constant 0 : index
    %c0_6 = arith.constant 0 : index
    %4 = vector.load %arg4[%c0_5, %c0_6] : memref<8x7xf32, #tpu.memory_space<vmem>>, vector<8x7xf32>
    %cst = arith.constant dense<0.000000e+00> : vector<8x14xf32>
    %5 = tpu.matmul %4, %1, %cst {dimension_numbers = #tpu.dot_dimension_numbers<[1], [0], [0], [1], [0, 0, 1, 1], [], []>} : vector<8x7xf32>, vector<7x14xf32>, vector<8x14xf32> -> vector<8x14xf32>
    %c0_7 = arith.constant 0 : index
    %c0_8 = arith.constant 0 : index
    %6 = vector.load %arg5[%c0_7, %c0_8] : memref<8x7xf32, #tpu.memory_space<vmem>>, vector<8x7xf32>
    %cst_9 = arith.constant dense<0.000000e+00> : vector<8x14xf32>
    %7 = tpu.matmul %6, %3, %cst_9 {dimension_numbers = #tpu.dot_dimension_numbers<[1], [0], [0], [1], [0, 0, 1, 1], [], []>} : vector<8x7xf32>, vector<7x14xf32>, vector<8x14xf32> -> vector<8x14xf32>
    %8 = arith.addf %5, %7 : vector<8x14xf32>
    %c0_10 = arith.constant 0 : index
    %c0_11 = arith.constant 0 : index
    %9 = vector.load %arg6[%c0_10, %c0_11] : memref<8x1xf32, #tpu.memory_space<vmem>>, vector<8x1xf32>
    %10 = vector.broadcast %9 : vector<8x1xf32> to vector<8x14xf32>
    %11 = arith.addf %8, %10 : vector<8x14xf32>
    %cst_12 = arith.constant 0.000000e+00 : f32
    %12 = vector.broadcast %cst_12 : f32 to vector<8x14xf32>
    %13 = arith.maximumf %11, %12 : vector<8x14xf32>
    %c0_13 = arith.constant 0 : index
    %c0_14 = arith.constant 0 : index
    %14 = vector.load %arg7[%c0_13, %c0_14] : memref<8x8xf32, #tpu.memory_space<vmem>>, vector<8x8xf32>
    %cst_15 = arith.constant dense<0.000000e+00> : vector<8x14xf32>
    %15 = tpu.matmul %14, %13, %cst_15 {dimension_numbers = #tpu.dot_dimension_numbers<[1], [0], [0], [1], [0, 0, 1, 1], [], []>} : vector<8x8xf32>, vector<8x14xf32>, vector<8x14xf32> -> vector<8x14xf32>
    %c0_16 = arith.constant 0 : index
    %c0_17 = arith.constant 0 : index
    %16 = vector.load %arg8[%c0_16, %c0_17] : memref<8x1xf32, #tpu.memory_space<vmem>>, vector<8x1xf32>
    %17 = vector.broadcast %16 : vector<8x1xf32> to vector<8x14xf32>
    %18 = arith.addf %15, %17 : vector<8x14xf32>
    %cst_18 = arith.constant 0.000000e+00 : f32
    %19 = vector.broadcast %cst_18 : f32 to vector<8x14xf32>
    %20 = arith.maximumf %18, %19 : vector<8x14xf32>
    %c0_19 = arith.constant 0 : index
    %c0_20 = arith.constant 0 : index
    %c0_21 = arith.constant 0 : index
    %21 = vector.load %arg9[%c0_19, %c0_20, %c0_21] : memref<1x8x14xf32, #tpu.memory_space<vmem>>, vector<1x8x14xf32>
    %22 = vector.shape_cast %21 : vector<1x8x14xf32> to vector<8x14xf32>
    %23 = vector.shape_cast %20 : vector<8x14xf32> to vector<1x8x14xf32>
    tpu.vector_store %arg9[%c0_19, %c0_20, %c0_21], %23 {strides = array<i32>} : memref<1x8x14xf32, #tpu.memory_space<vmem>>, vector<1x8x14xf32>,
    return
  }
  func.func @transform_0(%arg0: i32, %arg1: i32) -> (i32, i32, i32) {
    %c0_i32 = arith.constant 0 : i32
    %c0_i32_0 = arith.constant 0 : i32
    return %arg0, %c0_i32, %arg1 : i32, i32, i32
  }
  func.func @transform_1(%arg0: i32, %arg1: i32) -> (i32, i32, i32) {
    %c0_i32 = arith.constant 0 : i32
    %c0_i32_0 = arith.constant 0 : i32
    return %arg0, %c0_i32, %arg1 : i32, i32, i32
  }
  func.func @transform_2(%arg0: i32, %arg1: i32) -> (i32, i32) {
    %c0_i32 = arith.constant 0 : i32
    %c0_i32_0 = arith.constant 0 : i32
    %c0_i32_1 = arith.constant 0 : i32
    return %c0_i32, %c0_i32_0 : i32, i32
  }
  func.func @transform_3(%arg0: i32, %arg1: i32) -> (i32, i32) {
    %c0_i32 = arith.constant 0 : i32
    %c0_i32_0 = arith.constant 0 : i32
    %c0_i32_1 = arith.constant 0 : i32
    return %c0_i32, %c0_i32_0 : i32, i32
  }
  func.func @transform_4(%arg0: i32, %arg1: i32) -> (i32, i32) {
    %c0_i32 = arith.constant 0 : i32
    %c0_i32_0 = arith.constant 0 : i32
    %c0_i32_1 = arith.constant 0 : i32
    return %c0_i32, %c0_i32_0 : i32, i32
  }
  func.func @transform_5(%arg0: i32, %arg1: i32) -> (i32, i32) {
    %c0_i32 = arith.constant 0 : i32
    %c0_i32_0 = arith.constant 0 : i32
    %c0_i32_1 = arith.constant 0 : i32
    return %c0_i32, %c0_i32_0 : i32, i32
  }
  func.func @transform_6(%arg0: i32, %arg1: i32) -> (i32, i32) {
    %c0_i32 = arith.constant 0 : i32
    %c0_i32_0 = arith.constant 0 : i32
    %c0_i32_1 = arith.constant 0 : i32
    return %c0_i32, %c0_i32_0 : i32, i32
  }
  func.func @transform_7(%arg0: i32, %arg1: i32) -> (i32, i32, i32) {
    %c0_i32 = arith.constant 0 : i32
    %c0_i32_0 = arith.constant 0 : i32
    return %arg0, %c0_i32, %arg1 : i32, i32, i32
  }
}

</mosaic_0001>

<bundles_post_ra>
// kernel: tpu_custom_call.1
= control target key start
LH: loop header
LB: loop body
LE: loop exit
PB: predicated region body
PF: predicated region fallthrough
CT: control target
= control target key end

     0   :  { %12 = vsyncpa [#allocation3], 0  ;;  %s1017_s0 = inlined_call_operand.vmem [shape: f32[2,7,14], index: 0, kind: input, shape index: {}]   ;;  %s1018_s1 = inlined_call_operand.vmem [shape: f32[2,7,14], index: 1, kind: input, shape index: {}]   ;;  %s1019_s2 = inlined_call_operand.vmem [shape: f32[8,7], index: 2, kind: input, shape index: {}]   ;;  %s1020_s3 = inlined_call_operand.vmem [shape: f32[8,7], index: 3, kind: input, shape index: {}]   ;;  %s1021_s4 = inlined_call_operand.vmem [shape: f32[8,1], index: 4, kind: input, shape index: {}]   ;;  %s1022_s5 = inlined_call_operand.vmem [shape: f32[8,8], index: 5, kind: input, shape index: {}]   ;;  %s1023_s6 = inlined_call_operand.vmem [shape: f32[8,1], index: 6, kind: input, shape index: {}]   ;;  %s1024_s7 = inlined_call_operand.hbm [shape: f32[2,8,14], index: 7, kind: output, shape index: {}]  }
   0x1   :  { %14 = vsyncpa [#allocation3 + $0x1], 0  ;;  %s897_s24 = smov 0   ;;  %s899_s25 = smov 0  }
   0x2   :  { %s901_s26 = smov 0   ;;  %s903_s27 = smov 0  }
   0x3   :  { %s905_s28 = smov 0   ;;  %s907_s29 = smov 0  }
   0x4 LB: > { %s678_s30 = sadd.s32 4294967295, %s851_s29   ;;  %s679_s8 = sadd.s32 4294967294, %s851_s29   ;;  %s851_s29 = sphi %s907_s29, %s20_s29   ;;  %s847_s28 = sphi %s905_s28, %s1031_s28   ;;  %s843_s27 = sphi %s903_s27, %s1030_s27   ;;  %s839_s26 = sphi %s901_s26, %s1029_s26   ;;  %s835_s25 = sphi %s899_s25, %s1028_s25   ;;  %s831_s24 = sphi %s897_s24, %s1027_s24  }
   0x5   : > { %s32_s9 = sadd.s32 1, %s847_s28  ;;  %s202_s10 = sadd.s32 1, %s839_s26 }
   0x6   : > { %p34_p0 = scmp.ge.s32.totalorder %s32_s9, 2  ;;  %p212_p1 = scmp.ne.s32.totalorder %s839_s26, %s835_s25 }
   0x7   : > { %p213_p2 = scmp.eq.s32.totalorder %s678_s30, 1  ;;  %p218_p3 = scmp.ne.s32.totalorder %s835_s25, %s831_s24 }
   0x8   : > { %s1033_s9 = smov (%p34_p0, %s32_s9), 0  ;;  %p219_p5 = scmp.eq.s32.totalorder %s679_s8, 1 }
   0x9   : > { %p937_p4 = por %p213_p2, %p212_p1  ;;  %s197_s12 = ssub.s32 %s847_s28, %s1033_s9 }
   0xa   : > { %p682_p6 = scmp.ge.s32.totalorder %s851_s29, 1  ;;  %p200_p7 = scmp.eq.s32.totalorder %s197_s12, 0 }
   0xb   : > { %p944_p8 = por %p219_p5, %p218_p3  ;;  %p272_p9 = scmp.lt.s32.totalorder %s851_s29, 3 }
   0xc   : > { %s950_s14 = scalar_select %p200_p7, %s839_s26, %s202_s10  }
   0xd   : > { %p273_p10 = pnand %p682_p6, %p272_p9 }
   0xe   : > { %p313_p11 = scmp.lt.s32.totalorder (!%p273_p10), %s843_s27, 1  ;;  %s310_s20 = sand.u32 (!%p273_p10), 1, %s835_s25  }
   0xf   : > { %276 = sbr.rel (%p273_p10) target bundleno = 437 (0x1b5), region = 48  ;;  %s692_s22 = sshll.u32 (!%p273_p10), %s843_s27, 7 }
  0x10   : > { %s590_s12 = scalar_lea.hbm (!%p273_p10), %s1024_s7, %s692_s22  ;;  %s578_s15 = scalar_lea.sflag (!%p273_p10), [#allocation3], %s310_s20 }
  0x14   : > { %v853_v0 = vmov 0.0   ;;  %v485_v1 = vld [vmem:[%s1021_s4] sm:$0xff]  ;;  %s314_s17 = scalar_select %p313_p11, %s843_s27, 1  ;;  %vm854_vm0 = vmmov 0   ;;  %v855_v2 = vmov 0   ;;  %vm335_vm1 = vcmask 1046528  }
  0x15   : > { %701 = vmatprep.subr.mxu0 %v853_v0  ;;  %706 = vmatprep.subr.mxu1 %v853_v0  ;;  %v330_v3 = vld [vmem:[%s1020_s3] sm:$0xff]  ;;  %vm331_vm2 = vcmask 56320   ;;  %vm500_vm3 = vcmask 64512   ;;  %vm575_vm4 = vcmask 113664  }
  0x16   : > { %703 = vmatprep.mubr.msk.f32.mxu0 %vm854_vm0, %v853_v0  ;;  %708 = vmatprep.mubr.msk.f32.mxu1 %vm854_vm0, %v853_v0  ;;  %s684_s18 = sshll.u32 %s314_s17, 3  ;;  %v329_v4 = vld [vmem:[%s1019_s2] sm:$0xff]  ;;  %s856_s17 = smov [#allocation2]  }
  0x17   : > { %774 = vset.pattern.permute.xlu0 %v855_v2  ;;  %s326_s21 = scalar_lea.vmem %s1018_s1, %s684_s18  ;;  %s319_s30 = scalar_lea.vmem %s1017_s0, %s684_s18  ;;  %v494_v7 = vld [vmem:[%s1023_s6] sm:$0xff] }
  0x18   : > { %488 = vperm.xlu0 %774, %v485_v1   ;;  %v328_v5 = vld [vmem:[%s326_s21] sm:$0x7f]  ;;  %s683_s21 = sshll.u32 %s310_s20, 3  ;;  %s779_s27 = sshll.u32 %s856_s17, 4  ;;  %s780_s27 = int_to_ptr.vmem [resolvable:$false] %s779_s27 }
  0x19   : > { %v327_v6 = vld [vmem:[%s319_s30] sm:$0x7f]  ;;  %702 = vmatpush3.msk.msra.mxu0 %vm335_vm1, %v328_v5  ;;  %s312_s23 = scalar_lea.vmem [#allocation2], %s683_s21  ;;  %s781_s18 = scalar_lea.vmem %s780_s27, 256 }
  0x1a   : > { %707 = vmatpush3.msk.msra.mxu1 %vm335_vm1, %v327_v6  ;;  %704 = vmatmul.mubr.msk.f32.vlgmr.msra.gmra.mxu0 %vm331_vm2, %v330_v3  ;;  %v493_v16 = vld [vmem:[%s1022_s5] sm:$0xff]  ;;  %s592_s30 = sshll.u32 %s312_s23, 4  ;;  %s593_s30 = int_to_ptr.vmem [resolvable:$true] %s592_s30 }
  0x1b   : > { %709 = vmatmul.mubr.msk.f32.vlgmr.msra.gmra.mxu1 %vm331_vm2, %v329_v4  ;;  %711 = vmatprep.subr.mxu0 %v853_v0  ;;  %s775_s16 = scalar_lea.vmem %s593_s30, 128  ;;  %p782_p1 = scmp.lt.s32.totalorder %s593_s30, %s780_s27 }
  0x1c   : > { %497 = vperm.xlu0 %774, %v494_v7   ;;  %713 = vmatprep.mubr.msk.f32.mxu0 %vm854_vm0, %v853_v0  ;;  %p776_p12 = scmp.ne.s32.totalorder %s593_s30, %s775_s16  ;;  %p783_p2 = scmp.lt.s32.totalorder %s781_s18, %s775_s16 }
  0x1e   : > { %p777_p13 = pnand %p776_p12, %p937_p4  ;;  %p784_p3 = por %p783_p2, %p782_p1 }
  0x20   : > { %p778_p0 = pneg %p777_p13 }
  0x22   : > { %p785_p5 = pnand %p784_p3, %p778_p0 }
  0x93   : > { %v489_v10 = vpop.permute.xlu0 %488 }
  0x97   : > { %v498_v17 = vpop.permute.xlu0 %497 }
  0xda   : > { %v405_v8 = vpop.f32.mrf.mxu0 }
  0xdb   : > { %v481_v9 = vpop.f32.mrf.mxu1 }
  0xdc   : > { %v482_v11 = vadd.f32 %v481_v9, %v405_v8  ;;  %v705_v12 = vpop.f32.mrf.mxu0 }
  0xdd   : > { %v710_v13 = vpop.f32.mrf.mxu1 }
  0xde   : > { %v491_v14 = vadd.f32 %v489_v10, %v482_v11 }
  0xe0   : > { %v492_v15 = vmax.f32 %v491_v14, 0.0 }
  0xe2   : > { %712 = vmatpush3.msra.mxu0 %v492_v15 }
  0xe3   : > { %714 = vmatmul.mubr.msk.f32.vlgmr.msra.gmra.mxu0 %vm500_vm3, %v493_v16 }
 0x1a3   : > { %v570_v18 = vpop.f32.mrf.mxu0 }
 0x1a4   : > { %v571_v19 = vadd.f32 %v570_v18, %v498_v17 }
 0x1a5   : > { %v715_v20 = vpop.f32.mrf.mxu0 }
 0x1a6   : > { %v574_v21 = vmax.f32 %v571_v19, 0.0 }
 0x1a8   : > { %576 = vst.msk [vmem:[%s312_s23] sm:$0xff] %vm575_vm4, %v574_v21 }
 0x1a9   : > { %788 = shalt.err (!%p785_p5)
}
 0x1aa   : > { %s789_s19 = scalar_lea.hbm %s590_s12, 128  ;;  %s793_s22 = scalar_lea.hbm %s1024_s7, 256 }
 0x1ab   : > { %p790_p6 = scmp.ne.s32.totalorder %s590_s12, %s789_s19  ;;  %p794_p10 = scmp.lt.s32.totalorder %s590_s12, %s1024_s7 }
 0x1ac   : > { %p795_p11 = scmp.lt.s32.totalorder %s793_s22, %s789_s19 }
 0x1ad   : > { %p791_p7 = pnand %p790_p6, %p937_p4 }
 0x1ae   : > { %p796_p12 = por %p795_p11, %p794_p10 }
 0x1af   : > { %p792_p9 = pneg %p791_p7 }
 0x1b1   : > { %p797_p13 = pnand %p796_p12, %p792_p9 }
 0x1b3   : > { %800 = shalt.err (!%p797_p13)
}
 0x1b4   : > { %716 = dma.vmem_to_hbm [thread:$0]  (%p937_p4), %s593_s30, 128, %s590_s12, %s578_s15  }
 0x1b5 PF: > { %p722_p0 = scmp.ge.s32.totalorder %s851_s29, 2  ;;  %s604_s10 = sand.u32 1, %s831_s24  }
 0x1b6   : > { %s605_s16 = scalar_lea.sflag [#allocation3], %s604_s10 }
 0x1b7   : > { %p719_p1 = pnand %p722_p0, %p944_p8 }
 0x1b9   : > { %p720_p2 = pneg %p719_p1 }
 0x1bb   : > { %826 = dma.done.wait (%p720_p2), %s605_s16, 128  }
 0x1bc   : > { %828 = vsyncadd (%p720_p2), %s605_s16, 4294967168  ;;  %s20_s29 = sadd.s32 1, %s851_s29   ;;  %s1027_s24 = smov %s835_s25 }
 0x1bd   : > { %p17_p3 = scmp.ge.s32.totalorder %s20_s29, 4   ;;  %s1028_s25 = smov %s839_s26 }
 0x1be   : > { %s1029_s26 = smov %s950_s14  ;;  %s1030_s27 = smov %s847_s28 }
 0x1bf   : > { %s1031_s28 = smov %s1033_s9  ;;  %19 = sbr.rel (!%p17_p3) target bundleno = 4 (0x4), region = 86 }
 0x1c4   :  { %610 = vsyncpa [#allocation3], 1 }
 0x1c5   :  { %612 = vsyncpa [#allocation3 + $0x1], 1 }

</bundles_post_ra>
